<compile_context>
chip_gen: v5e
topology: v5e:2x2
jax: 0.10.0
libtpu: 0.0.40
codegen_flags: <defaults>
</compile_context>

<pallas_src>
import jax
import jax.numpy as jnp
from jax.experimental import pallas as pl
from jax.experimental.pallas import tpu as pltpu


def _softplus(x):
    # numerically safe softplus usable inside the kernel
    return jnp.where(x > 20.0, x, jnp.log1p(jnp.exp(jnp.minimum(x, 20.0))))


def nvp_coupling_kernel(idx_ref, x_ref, tf_ref, w1x_ref, w1t_ref, b1_ref,
                        w2_ref, b2_ref, out_ref):
    l = pl.program_id(1)

    # initialize the carried state from the (normalized) input coordinates
    @pl.when(l == 0)
    def _():
        out_ref[...] = x_ref[...]

    cur = out_ref[...]                                   # [3, PT] current coords
    rid = jax.lax.broadcasted_iota(jnp.int32, (3, 1), 0)

    # per-layer channel indices from SMEM (scalar prefetch):
    #   idx[l] = [kept0, kept1 (ascending), warped]
    k0 = idx_ref[l, 0]
    k1 = idx_ref[l, 1]
    kw = idx_ref[l, 2]

    m_k0 = (rid == k0).astype(jnp.float32)               # [3, 1]
    m_k1 = (rid == k1).astype(jnp.float32)
    m2 = (rid == kw).astype(jnp.float32)                 # one-hot of warped channel
    m1 = 1.0 - m2

    # gather conditioning channels (ascending order, as x[..., mask.bool()]) + tanh,
    # and the channel being warped (query of the piecewise-linear interp).
    # VPU mask-multiply + tiny sublane reduce; no MXU push, no lane gather.
    xm0 = jnp.tanh(jnp.sum(cur * m_k0, axis=0, keepdims=True))   # [1, PT]
    xm1 = jnp.tanh(jnp.sum(cur * m_k1, axis=0, keepdims=True))   # [1, PT]
    qx = jnp.sum(cur * m2, axis=0, keepdims=True)                # [1, PT]

    # ---- map_st (synthetic Triplane stand-in): 2-layer MLP, lane-dense -------
    # time-feature part: one MXU dot (contraction T); coordinate part: two
    # rank-1 VPU updates (contraction of 2 would waste the MXU).
    w1x = w1x_ref[l]                                     # [H, 2]
    h = (jnp.dot(w1t_ref[l], tf_ref[...], preferred_element_type=jnp.float32)
         + w1x[:, 0:1] * xm0 + w1x[:, 1:2] * xm1
         + b1_ref[l])                                    # [H, PT]
    h = jnp.where(h > 0, h, 0.01 * h)                    # LeakyReLU(0.01)
    o = jnp.dot(w2_ref[l], h, preferred_element_type=jnp.float32) + b2_ref[l]
    d = _softplus(o) + 1e-3                              # dxdykk > 0, [10, PT]

    # split order matches CouplingLayer.get_all_xy
    dxl2, dxl1 = d[0:1, :], d[1:2, :]
    dxr1, dxr2 = d[2:3, :], d[3:4, :]
    dyl2, dyl1 = d[4:5, :], d[5:6, :]
    dyr1, dyr2 = d[6:7, :], d[7:8, :]
    kl = d[8:9, :] * 2.0
    kr = d[9:10, :] * 2.0

    # get_xy_compute: 6 knots of the piecewise-linear warp
    xL1 = -dxl1
    xL2 = -dxl1 - dxl2
    yL1 = -dyl1
    yL2 = -dyl1 - dyl2
    xR1 = dxr1
    xR2 = dxr1 + dxr2
    yR1 = dyr1
    yR2 = dyr1 + dyr2
    xR3 = xR2 + 10000.0
    xL3 = xL2 - 10000.0
    yR3 = yR2 + kr * 10000.0
    yL3 = yL2 - kl * 10000.0

    # InterpGrad.forw_compute forward value (vectorized over the 5 segments).
    # NOTE: clip bounds xL3*0.99 / xR3*0.99 assume xL3 < 0 < xR3, which holds
    # because every d* above is > 1e-3.
    qc = jnp.clip(qx, xL3 * 0.99, xR3 * 0.99)

    def seg(xl_, xr_, yl_, yr_):
        in_range = (qc >= xl_) & (qc < xr_)
        slope = (yr_ - yl_) * pl.reciprocal(xr_ - xl_, approx=True)  # EUP, not VPU div
        return jnp.where(in_range, slope * (qc - xl_) + yl_, 0.0)

    interp = (seg(xL3, xL2, yL3, yL2)
              + seg(xL2, xL1, yL2, yL1)
              + seg(xL1, xR1, yL1, yR1)
              + seg(xR1, xR2, yR1, yR2)
              + seg(xR2, xR3, yR2, yR3))                 # [1, PT]

    # y = x * mask ; y[..., (1 - mask).bool()] = interp
    out_ref[...] = cur * m1 + interp * m2


def nvp_forward(x, t_feat, params, p_tile=2048):
    """x: [B, N, K, 3] normalized coords, t_feat: [N, T]. Returns warped coords."""
    idx, w1x, w1t, b1, w2, b2 = params
    B, N, K, C = x.shape
    T = t_feat.shape[-1]
    L, H, _ = w1t.shape

    P = B * N * K
    PT = min(p_tile, ((P + 127) // 128) * 128)           # lane tile, multiple of 128
    Ppad = ((P + PT - 1) // PT) * PT

    # transpose so points sit on the lane axis (lane-dense compute & stores)
    x_t = x.reshape(P, C).T                              # [3, P]
    # TODO(synk): replicating t_feat over B*K inflates the HBM stream by B*K;
    # removing it would need P-tiles aligned to per-frame slabs (lane gather otherwise).
    tf_t = jnp.broadcast_to(t_feat[None, :, None, :], (B, N, K, T)).reshape(P, T).T
    if Ppad != P:
        x_t = jnp.pad(x_t, ((0, 0), (0, Ppad - P)))
        tf_t = jnp.pad(tf_t, ((0, 0), (0, Ppad - P)))

    out = pl.pallas_call(
        nvp_coupling_kernel,
        out_shape=jax.ShapeDtypeStruct((C, Ppad), jnp.float32),
        grid_spec=pltpu.PrefetchScalarGridSpec(
            num_scalar_prefetch=1,                       # idx -> SMEM
            grid=(Ppad // PT, L),                        # layer axis innermost (carry)
            in_specs=[
                pl.BlockSpec((C, PT), lambda p, l, idx: (0, p)),      # coords
                pl.BlockSpec((T, PT), lambda p, l, idx: (0, p)),      # t features
                pl.BlockSpec((L, H, 2), lambda p, l, idx: (0, 0, 0)),   # W1 coord part (resident, all layers)
                pl.BlockSpec((L, H, T), lambda p, l, idx: (0, 0, 0)),   # W1 t-feat part
                pl.BlockSpec((L, H, 1), lambda p, l, idx: (0, 0, 0)),   # b1
                pl.BlockSpec((L, 10, H), lambda p, l, idx: (0, 0, 0)),  # W2
                pl.BlockSpec((L, 10, 1), lambda p, l, idx: (0, 0, 0)),  # b2
            ],
            out_specs=pl.BlockSpec((C, PT), lambda p, l, idx: (0, p)),
        ),
        compiler_params=pltpu.CompilerParams(
            dimension_semantics=("parallel", "arbitrary"),
            vmem_limit_bytes=32 * 1024 * 1024,           # fits v7x's smaller VMEM
        ),
    )(idx, x_t, tf_t, w1x, w1t, b1, w2, b2)
    return out[:, :P].T.reshape(B, N, K, C)


# ---------------- plain-JAX glue (parameter setup, t-feature sampling) -------

def grid_sample_1d(emb, t_norm):
    """F.grid_sample(emb [1,C,1,R], grid [1,N,1,2], align_corners=True) along W."""
    C, R = emb.shape[1], emb.shape[3]
    vals = emb[0, :, 0, :]                               # [C, R]
    pos = (t_norm + 1.0) * 0.5 * (R - 1)                 # align_corners=True
    i0 = jnp.clip(jnp.floor(pos), 0, R - 1).astype(jnp.int32)
    i1 = jnp.clip(i0 + 1, 0, R - 1)
    w = pos - i0.astype(jnp.float32)
    out = vals[:, i0] * (1.0 - w) + vals[:, i1] * w      # [C, N]
    return out.T                                         # [N, C]


def get_t_feature(t, t_embeddings):
    """t: [N, 1] in [0, 1] -> [N, sum(t_dim)]"""
    t_norm = t[:, 0] * 2.0 - 1.0
    feats = [grid_sample_1d(emb, t_norm) for emb in t_embeddings]
    return jnp.concatenate(feats, axis=-1)


if __name__ == "__main__":
    key = jax.random.PRNGKey(0)
    keys = jax.random.split(key, 20)

    # module config (small, consistent with NVPnonlin.__init__)
    n_layers = 3
    n_frames = 40
    t_dim = 8
    feature_dim = 32
    input_dims = 3
    B, N, K = 2, 4, 64                       # x: [B, N, K, 3], t: [N, 1]

    # t embeddings: [1, t_dim, 1, res], res from n_frames // 20
    t_baseres = n_frames // 20
    t_res = [t_baseres, t_baseres * 5, t_baseres * 13]
    t_embeddings = [jax.random.normal(keys[i], (1, t_dim, 1, r), jnp.float32) * 0.001
                    for i, r in enumerate(t_res)]
    T = t_dim * len(t_res)

    # mask selection: one randperm(3) covers n_layers = 3
    mask_sel = jax.random.permutation(keys[3], input_dims)

    idx_rows = []
    for i in range(n_layers):
        mask2 = jnp.zeros((input_dims,), jnp.float32).at[mask_sel[i]].set(1.0)
        mask1 = 1.0 - mask2
        kept = jnp.nonzero(mask1, size=2)[0]             # ascending, like torch masking
        idx_rows.append(jnp.concatenate(
            [kept.astype(jnp.int32), mask_sel[i:i + 1].astype(jnp.int32)]))
    idx = jnp.stack(idx_rows).astype(jnp.int32)          # [L, 3]

    # synthetic map_st MLP weights (deterministic), pre-transposed for the
    # points-on-lanes layout (W^T @ X form)
    H = feature_dim
    kW = jax.random.split(keys[4], n_layers * 5)
    w1x = jnp.stack([(jax.random.normal(kW[5 * i + 0], (2, H), jnp.float32) * 0.3).T
                     for i in range(n_layers)])          # [L, H, 2]
    w1t = jnp.stack([(jax.random.normal(kW[5 * i + 1], (T, H), jnp.float32) * 0.1).T
                     for i in range(n_layers)])          # [L, H, T]
    b1 = jnp.stack([(jax.random.normal(kW[5 * i + 2], (1, H), jnp.float32) * 0.1).T
                    for i in range(n_layers)])           # [L, H, 1]
    w2 = jnp.stack([(jax.random.normal(kW[5 * i + 3], (H, 10), jnp.float32) * 0.1).T
                    for i in range(n_layers)])           # [L, 10, H]
    b2 = jnp.stack([(jax.random.normal(kW[5 * i + 4], (1, 10), jnp.float32) * 0.1).T
                    for i in range(n_layers)])           # [L, 10, 1]

    # inputs
    t = jax.random.uniform(keys[10], (N, 1), jnp.float32)                      # times in [0,1]
    f = None                                                                   # unused by forward
    x = jax.random.uniform(keys[11], (B, N, K, 3), jnp.float32, minval=-1.0, maxval=1.0)

    # bound normalization (bound = [[-1,-1,-1],[1,1,1]] -> identity; kept for fidelity)
    bound = jnp.array([[-1.0, -1.0, -1.0], [1.0, 1.0, 1.0]], jnp.float32)
    center = (bound[1] + bound[0]) / 2.0
    half = (bound[1] - bound[0]) / 2.0
    x_n = (x - center) / half

    t_feat = get_t_feature(t, t_embeddings)                                    # [N, 3*t_dim]

    # small p_tile here so the demo exercises both grid axes (2 P-tiles x 3 layers)
    y = nvp_forward(x_n, t_feat, (idx, w1x, w1t, b1, w2, b2), p_tile=256)
    jax.block_until_ready(y)
    assert y.shape == (B, N, K, 3)
    print("KERNEL_OK")
</pallas_src>

<mosaic_0001>
module attributes {stable_mosaic.version = 11 : i64} {
  func.func @nvp_coupling_kernel(%arg0: i32, %arg1: i32, %arg2: memref<3x3xi32, #tpu.memory_space<smem>>, %arg3: memref<3x256xf32, #tpu.memory_space<vmem>>, %arg4: memref<24x256xf32, #tpu.memory_space<vmem>>, %arg5: memref<3x32x2xf32, #tpu.memory_space<vmem>>, %arg6: memref<3x32x24xf32, #tpu.memory_space<vmem>>, %arg7: memref<3x32x1xf32, #tpu.memory_space<vmem>>, %arg8: memref<3x10x32xf32, #tpu.memory_space<vmem>>, %arg9: memref<3x10x1xf32, #tpu.memory_space<vmem>>, %arg10: memref<3x256xf32, #tpu.memory_space<vmem>>) attributes {dimension_semantics = [#tpu.dimension_semantics<parallel>, #tpu.dimension_semantics<arbitrary>], iteration_bounds = array<i64: 2, 3>, scalar_prefetch = 1 : i64, scratch_operands = 0 : i64, tpu.core_type = #tpu.core_type<tc>, window_params = [{transform_indices = @transform_0, window_bounds = array<i64: 3, 256>}, {transform_indices = @transform_1, window_bounds = array<i64: 24, 256>}, {pipeline_mode = #tpu.pipeline_mode<synchronous>, transform_indices = @transform_2, window_bounds = array<i64: 3, 32, 2>}, {pipeline_mode = #tpu.pipeline_mode<synchronous>, transform_indices = @transform_3, window_bounds = array<i64: 3, 32, 24>}, {pipeline_mode = #tpu.pipeline_mode<synchronous>, transform_indices = @transform_4, window_bounds = array<i64: 3, 32, 1>}, {pipeline_mode = #tpu.pipeline_mode<synchronous>, transform_indices = @transform_5, window_bounds = array<i64: 3, 10, 32>}, {pipeline_mode = #tpu.pipeline_mode<synchronous>, transform_indices = @transform_6, window_bounds = array<i64: 3, 10, 1>}, {transform_indices = @transform_7, window_bounds = array<i64: 3, 256>}]} {
    %c0_i32 = arith.constant 0 : i32
    %0 = arith.cmpi eq, %arg1, %c0_i32 : i32
    %1 = arith.extui %0 : i1 to i32
    %c0_i32_0 = arith.constant 0 : i32
    %2 = arith.cmpi ne, %1, %c0_i32_0 : i32
    scf.if %2 {
      %c0_44 = arith.constant 0 : index
      %c0_45 = arith.constant 0 : index
      %198 = vector.load %arg3[%c0_44, %c0_45] : memref<3x256xf32, #tpu.memory_space<vmem>>, vector<3x256xf32>
      %c0_46 = arith.constant 0 : index
      %c0_47 = arith.constant 0 : index
      %199 = vector.load %arg10[%c0_46, %c0_47] : memref<3x256xf32, #tpu.memory_space<vmem>>, vector<3x256xf32>
      tpu.vector_store %arg10[%c0_46, %c0_47], %198 {strides = array<i32>} : memref<3x256xf32, #tpu.memory_space<vmem>>, vector<3x256xf32>,
    } else {
    }
    %c0 = arith.constant 0 : index
    %c0_1 = arith.constant 0 : index
    %3 = vector.load %arg10[%c0, %c0_1] : memref<3x256xf32, #tpu.memory_space<vmem>>, vector<3x256xf32>
    %4 = tpu.iota {dimensions = array<i32: 0>} : vector<3x1xi32>
    %5 = arith.index_cast %arg1 : i32 to index
    %c0_2 = arith.constant 0 : index
    %6 = memref.load %arg2[%5, %c0_2] : memref<3x3xi32, #tpu.memory_space<smem>>
    %7 = arith.index_cast %arg1 : i32 to index
    %c1 = arith.constant 1 : index
    %8 = memref.load %arg2[%7, %c1] : memref<3x3xi32, #tpu.memory_space<smem>>
    %9 = arith.index_cast %arg1 : i32 to index
    %c2 = arith.constant 2 : index
    %10 = memref.load %arg2[%9, %c2] : memref<3x3xi32, #tpu.memory_space<smem>>
    %11 = vector.broadcast %6 : i32 to vector<3x1xi32>
    %12 = arith.cmpi eq, %4, %11 : vector<3x1xi32>
    %13 = arith.extui %12 : vector<3x1xi1> to vector<3x1xi32>
    %14 = arith.sitofp %13 : vector<3x1xi32> to vector<3x1xf32>
    %15 = vector.broadcast %8 : i32 to vector<3x1xi32>
    %16 = arith.cmpi eq, %4, %15 : vector<3x1xi32>
    %17 = arith.extui %16 : vector<3x1xi1> to vector<3x1xi32>
    %18 = arith.sitofp %17 : vector<3x1xi32> to vector<3x1xf32>
    %19 = vector.broadcast %10 : i32 to vector<3x1xi32>
    %20 = arith.cmpi eq, %4, %19 : vector<3x1xi32>
    %21 = arith.extui %20 : vector<3x1xi1> to vector<3x1xi32>
    %22 = arith.sitofp %21 : vector<3x1xi32> to vector<3x1xf32>
    %cst = arith.constant 1.000000e+00 : f32
    %23 = vector.broadcast %cst : f32 to vector<3x1xf32>
    %24 = arith.subf %23, %22 : vector<3x1xf32>
    %25 = vector.broadcast %14 : vector<3x1xf32> to vector<3x256xf32>
    %26 = arith.mulf %3, %25 : vector<3x256xf32>
    %cst_3 = arith.constant dense<0.000000e+00> : vector<256xf32>
    %27 = vector.multi_reduction <add>, %26, %cst_3 [0] : vector<3x256xf32> to vector<256xf32>
    %28 = vector.shape_cast %27 : vector<256xf32> to vector<1x256xf32>
    %29 = math.tanh %28 : vector<1x256xf32>
    %30 = vector.broadcast %18 : vector<3x1xf32> to vector<3x256xf32>
    %31 = arith.mulf %3, %30 : vector<3x256xf32>
    %cst_4 = arith.constant dense<0.000000e+00> : vector<256xf32>
    %32 = vector.multi_reduction <add>, %31, %cst_4 [0] : vector<3x256xf32> to vector<256xf32>
    %33 = vector.shape_cast %32 : vector<256xf32> to vector<1x256xf32>
    %34 = math.tanh %33 : vector<1x256xf32>
    %35 = vector.broadcast %22 : vector<3x1xf32> to vector<3x256xf32>
    %36 = arith.mulf %3, %35 : vector<3x256xf32>
    %cst_5 = arith.constant dense<0.000000e+00> : vector<256xf32>
    %37 = vector.multi_reduction <add>, %36, %cst_5 [0] : vector<3x256xf32> to vector<256xf32>
    %38 = vector.shape_cast %37 : vector<256xf32> to vector<1x256xf32>
    %39 = arith.index_cast %arg1 : i32 to index
    %c0_6 = arith.constant 0 : index
    %c0_7 = arith.constant 0 : index
    %40 = vector.load %arg5[%39, %c0_6, %c0_7] : memref<3x32x2xf32, #tpu.memory_space<vmem>>, vector<1x32x2xf32>
    %41 = vector.shape_cast %40 : vector<1x32x2xf32> to vector<32x2xf32>
    %42 = arith.index_cast %arg1 : i32 to index
    %c0_8 = arith.constant 0 : index
    %c0_9 = arith.constant 0 : index
    %43 = vector.load %arg6[%42, %c0_8, %c0_9] : memref<3x32x24xf32, #tpu.memory_space<vmem>>, vector<1x32x24xf32>
    %44 = vector.shape_cast %43 : vector<1x32x24xf32> to vector<32x24xf32>
    %c0_10 = arith.constant 0 : index
    %c0_11 = arith.constant 0 : index
    %45 = vector.load %arg4[%c0_10, %c0_11] : memref<24x256xf32, #tpu.memory_space<vmem>>, vector<24x256xf32>
    %cst_12 = arith.constant dense<0.000000e+00> : vector<32x256xf32>
    %46 = tpu.matmul %44, %45, %cst_12 {dimension_numbers = #tpu.dot_dimension_numbers<[1], [0], [0], [1], [0, 0, 1, 1], [], []>} : vector<32x24xf32>, vector<24x256xf32>, vector<32x256xf32> -> vector<32x256xf32>
    %47 = vector.extract_strided_slice %41 {offsets = [0, 0], sizes = [32, 1], strides = [1, 1]} : vector<32x2xf32> to vector<32x1xf32>
    %48 = vector.broadcast %47 : vector<32x1xf32> to vector<32x256xf32>
    %49 = vector.broadcast %29 : vector<1x256xf32> to vector<32x256xf32>
    %50 = arith.mulf %48, %49 : vector<32x256xf32>
    %51 = arith.addf %46, %50 : vector<32x256xf32>
    %52 = vector.extract_strided_slice %41 {offsets = [0, 1], sizes = [32, 1], strides = [1, 1]} : vector<32x2xf32> to vector<32x1xf32>
    %53 = vector.broadcast %52 : vector<32x1xf32> to vector<32x256xf32>
    %54 = vector.broadcast %34 : vector<1x256xf32> to vector<32x256xf32>
    %55 = arith.mulf %53, %54 : vector<32x256xf32>
    %56 = arith.addf %51, %55 : vector<32x256xf32>
    %57 = arith.index_cast %arg1 : i32 to index
    %c0_13 = arith.constant 0 : index
    %c0_14 = arith.constant 0 : index
    %58 = vector.load %arg7[%57, %c0_13, %c0_14] : memref<3x32x1xf32, #tpu.memory_space<vmem>>, vector<1x32x1xf32>
    %59 = vector.shape_cast %58 : vector<1x32x1xf32> to vector<32x1xf32>
    %60 = vector.broadcast %59 : vector<32x1xf32> to vector<32x256xf32>
    %61 = arith.addf %56, %60 : vector<32x256xf32>
    %cst_15 = arith.constant 0.000000e+00 : f32
    %62 = vector.broadcast %cst_15 : f32 to vector<32x256xf32>
    %63 = arith.cmpf ogt, %61, %62 : vector<32x256xf32>
    %cst_16 = arith.constant 0.00999999977 : f32
    %64 = vector.broadcast %cst_16 : f32 to vector<32x256xf32>
    %65 = arith.mulf %64, %61 : vector<32x256xf32>
    %66 = arith.select %63, %61, %65 : vector<32x256xi1>, vector<32x256xf32>
    %67 = arith.index_cast %arg1 : i32 to index
    %c0_17 = arith.constant 0 : index
    %c0_18 = arith.constant 0 : index
    %68 = vector.load %arg8[%67, %c0_17, %c0_18] : memref<3x10x32xf32, #tpu.memory_space<vmem>>, vector<1x10x32xf32>
    %69 = vector.shape_cast %68 : vector<1x10x32xf32> to vector<10x32xf32>
    %cst_19 = arith.constant dense<0.000000e+00> : vector<10x256xf32>
    %70 = tpu.matmul %69, %66, %cst_19 {dimension_numbers = #tpu.dot_dimension_numbers<[1], [0], [0], [1], [0, 0, 1, 1], [], []>} : vector<10x32xf32>, vector<32x256xf32>, vector<10x256xf32> -> vector<10x256xf32>
    %71 = arith.index_cast %arg1 : i32 to index
    %c0_20 = arith.constant 0 : index
    %c0_21 = arith.constant 0 : index
    %72 = vector.load %arg9[%71, %c0_20, %c0_21] : memref<3x10x1xf32, #tpu.memory_space<vmem>>, vector<1x10x1xf32>
    %73 = vector.shape_cast %72 : vector<1x10x1xf32> to vector<10x1xf32>
    %74 = vector.broadcast %73 : vector<10x1xf32> to vector<10x256xf32>
    %75 = arith.addf %70, %74 : vector<10x256xf32>
    %cst_22 = arith.constant 2.000000e+01 : f32
    %76 = vector.broadcast %cst_22 : f32 to vector<10x256xf32>
    %77 = arith.cmpf ogt, %75, %76 : vector<10x256xf32>
    %cst_23 = arith.constant 2.000000e+01 : f32
    %78 = vector.broadcast %cst_23 : f32 to vector<10x256xf32>
    %79 = arith.minimumf %75, %78 : vector<10x256xf32>
    %80 = math.exp %79 : vector<10x256xf32>
    %81 = math.log1p %80 : vector<10x256xf32>
    %82 = arith.select %77, %75, %81 : vector<10x256xi1>, vector<10x256xf32>
    %cst_24 = arith.constant 1.000000e-03 : f32
    %83 = vector.broadcast %cst_24 : f32 to vector<10x256xf32>
    %84 = arith.addf %82, %83 : vector<10x256xf32>
    %85 = vector.extract_strided_slice %84 {offsets = [0, 0], sizes = [1, 256], strides = [1, 1]} : vector<10x256xf32> to vector<1x256xf32>
    %86 = vector.extract_strided_slice %84 {offsets = [1, 0], sizes = [1, 256], strides = [1, 1]} : vector<10x256xf32> to vector<1x256xf32>
    %87 = vector.extract_strided_slice %84 {offsets = [2, 0], sizes = [1, 256], strides = [1, 1]} : vector<10x256xf32> to vector<1x256xf32>
    %88 = vector.extract_strided_slice %84 {offsets = [3, 0], sizes = [1, 256], strides = [1, 1]} : vector<10x256xf32> to vector<1x256xf32>
    %89 = vector.extract_strided_slice %84 {offsets = [4, 0], sizes = [1, 256], strides = [1, 1]} : vector<10x256xf32> to vector<1x256xf32>
    %90 = vector.extract_strided_slice %84 {offsets = [5, 0], sizes = [1, 256], strides = [1, 1]} : vector<10x256xf32> to vector<1x256xf32>
    %91 = vector.extract_strided_slice %84 {offsets = [6, 0], sizes = [1, 256], strides = [1, 1]} : vector<10x256xf32> to vector<1x256xf32>
    %92 = vector.extract_strided_slice %84 {offsets = [7, 0], sizes = [1, 256], strides = [1, 1]} : vector<10x256xf32> to vector<1x256xf32>
    %93 = vector.extract_strided_slice %84 {offsets = [8, 0], sizes = [1, 256], strides = [1, 1]} : vector<10x256xf32> to vector<1x256xf32>
    %cst_25 = arith.constant 2.000000e+00 : f32
    %94 = vector.broadcast %cst_25 : f32 to vector<1x256xf32>
    %95 = arith.mulf %93, %94 : vector<1x256xf32>
    %96 = vector.extract_strided_slice %84 {offsets = [9, 0], sizes = [1, 256], strides = [1, 1]} : vector<10x256xf32> to vector<1x256xf32>
    %cst_26 = arith.constant 2.000000e+00 : f32
    %97 = vector.broadcast %cst_26 : f32 to vector<1x256xf32>
    %98 = arith.mulf %96, %97 : vector<1x256xf32>
    %cst_27 = arith.constant 0.000000e+00 : f32
    %99 = vector.broadcast %cst_27 : f32 to vector<1x256xf32>
    %100 = arith.subf %99, %86 : vector<1x256xf32>
    %cst_28 = arith.constant 0.000000e+00 : f32
    %101 = vector.broadcast %cst_28 : f32 to vector<1x256xf32>
    %102 = arith.subf %101, %86 : vector<1x256xf32>
    %103 = arith.subf %102, %85 : vector<1x256xf32>
    %cst_29 = arith.constant 0.000000e+00 : f32
    %104 = vector.broadcast %cst_29 : f32 to vector<1x256xf32>
    %105 = arith.subf %104, %90 : vector<1x256xf32>
    %cst_30 = arith.constant 0.000000e+00 : f32
    %106 = vector.broadcast %cst_30 : f32 to vector<1x256xf32>
    %107 = arith.subf %106, %90 : vector<1x256xf32>
    %108 = arith.subf %107, %89 : vector<1x256xf32>
    %109 = arith.addf %87, %88 : vector<1x256xf32>
    %110 = arith.addf %91, %92 : vector<1x256xf32>
    %cst_31 = arith.constant 1.000000e+04 : f32
    %111 = vector.broadcast %cst_31 : f32 to vector<1x256xf32>
    %112 = arith.addf %109, %111 : vector<1x256xf32>
    %cst_32 = arith.constant 1.000000e+04 : f32
    %113 = vector.broadcast %cst_32 : f32 to vector<1x256xf32>
    %114 = arith.subf %103, %113 : vector<1x256xf32>
    %cst_33 = arith.constant 1.000000e+04 : f32
    %115 = vector.broadcast %cst_33 : f32 to vector<1x256xf32>
    %116 = arith.mulf %98, %115 : vector<1x256xf32>
    %117 = arith.addf %110, %116 : vector<1x256xf32>
    %cst_34 = arith.constant 1.000000e+04 : f32
    %118 = vector.broadcast %cst_34 : f32 to vector<1x256xf32>
    %119 = arith.mulf %95, %118 : vector<1x256xf32>
    %120 = arith.subf %108, %119 : vector<1x256xf32>
    %cst_35 = arith.constant 9.900000e-01 : f32
    %121 = vector.broadcast %cst_35 : f32 to vector<1x256xf32>
    %122 = arith.mulf %114, %121 : vector<1x256xf32>
    %cst_36 = arith.constant 9.900000e-01 : f32
    %123 = vector.broadcast %cst_36 : f32 to vector<1x256xf32>
    %124 = arith.mulf %112, %123 : vector<1x256xf32>
    %125 = arith.maximumf %122, %38 : vector<1x256xf32>
    %126 = arith.minimumf %124, %125 : vector<1x256xf32>
    %127 = arith.cmpf oge, %126, %114 : vector<1x256xf32>
    %128 = arith.cmpf olt, %126, %103 : vector<1x256xf32>
    %129 = arith.andi %127, %128 : vector<1x256xi1>
    %130 = arith.subf %108, %120 : vector<1x256xf32>
    %131 = arith.subf %103, %114 : vector<1x256xf32>
    %132 = tpu.reciprocal %131 {approx = true} : vector<1x256xf32> -> vector<1x256xf32>
    %133 = arith.mulf %130, %132 : vector<1x256xf32>
    %134 = arith.subf %126, %114 : vector<1x256xf32>
    %135 = arith.mulf %133, %134 : vector<1x256xf32>
    %136 = arith.addf %135, %120 : vector<1x256xf32>
    %cst_37 = arith.constant 0.000000e+00 : f32
    %137 = vector.broadcast %cst_37 : f32 to vector<1x256xf32>
    %138 = arith.select %129, %136, %137 : vector<1x256xi1>, vector<1x256xf32>
    %139 = arith.cmpf oge, %126, %103 : vector<1x256xf32>
    %140 = arith.cmpf olt, %126, %100 : vector<1x256xf32>
    %141 = arith.andi %139, %140 : vector<1x256xi1>
    %142 = arith.subf %105, %108 : vector<1x256xf32>
    %143 = arith.subf %100, %103 : vector<1x256xf32>
    %144 = tpu.reciprocal %143 {approx = true} : vector<1x256xf32> -> vector<1x256xf32>
    %145 = arith.mulf %142, %144 : vector<1x256xf32>
    %146 = arith.subf %126, %103 : vector<1x256xf32>
    %147 = arith.mulf %145, %146 : vector<1x256xf32>
    %148 = arith.addf %147, %108 : vector<1x256xf32>
    %cst_38 = arith.constant 0.000000e+00 : f32
    %149 = vector.broadcast %cst_38 : f32 to vector<1x256xf32>
    %150 = arith.select %141, %148, %149 : vector<1x256xi1>, vector<1x256xf32>
    %151 = arith.addf %138, %150 : vector<1x256xf32>
    %152 = arith.cmpf oge, %126, %100 : vector<1x256xf32>
    %153 = arith.cmpf olt, %126, %87 : vector<1x256xf32>
    %154 = arith.andi %152, %153 : vector<1x256xi1>
    %155 = arith.subf %91, %105 : vector<1x256xf32>
    %156 = arith.subf %87, %100 : vector<1x256xf32>
    %157 = tpu.reciprocal %156 {approx = true} : vector<1x256xf32> -> vector<1x256xf32>
    %158 = arith.mulf %155, %157 : vector<1x256xf32>
    %159 = arith.subf %126, %100 : vector<1x256xf32>
    %160 = arith.mulf %158, %159 : vector<1x256xf32>
    %161 = arith.addf %160, %105 : vector<1x256xf32>
    %cst_39 = arith.constant 0.000000e+00 : f32
    %162 = vector.broadcast %cst_39 : f32 to vector<1x256xf32>
    %163 = arith.select %154, %161, %162 : vector<1x256xi1>, vector<1x256xf32>
    %164 = arith.addf %151, %163 : vector<1x256xf32>
    %165 = arith.cmpf oge, %126, %87 : vector<1x256xf32>
    %166 = arith.cmpf olt, %126, %109 : vector<1x256xf32>
    %167 = arith.andi %165, %166 : vector<1x256xi1>
    %168 = arith.subf %110, %91 : vector<1x256xf32>
    %169 = arith.subf %109, %87 : vector<1x256xf32>
    %170 = tpu.reciprocal %169 {approx = true} : vector<1x256xf32> -> vector<1x256xf32>
    %171 = arith.mulf %168, %170 : vector<1x256xf32>
    %172 = arith.subf %126, %87 : vector<1x256xf32>
    %173 = arith.mulf %171, %172 : vector<1x256xf32>
    %174 = arith.addf %173, %91 : vector<1x256xf32>
    %cst_40 = arith.constant 0.000000e+00 : f32
    %175 = vector.broadcast %cst_40 : f32 to vector<1x256xf32>
    %176 = arith.select %167, %174, %175 : vector<1x256xi1>, vector<1x256xf32>
    %177 = arith.addf %164, %176 : vector<1x256xf32>
    %178 = arith.cmpf oge, %126, %109 : vector<1x256xf32>
    %179 = arith.cmpf olt, %126, %112 : vector<1x256xf32>
    %180 = arith.andi %178, %179 : vector<1x256xi1>
    %181 = arith.subf %117, %110 : vector<1x256xf32>
    %182 = arith.subf %112, %109 : vector<1x256xf32>
    %183 = tpu.reciprocal %182 {approx = true} : vector<1x256xf32> -> vector<1x256xf32>
    %184 = arith.mulf %181, %183 : vector<1x256xf32>
    %185 = arith.subf %126, %109 : vector<1x256xf32>
    %186 = arith.mulf %184, %185 : vector<1x256xf32>
    %187 = arith.addf %186, %110 : vector<1x256xf32>
    %cst_41 = arith.constant 0.000000e+00 : f32
    %188 = vector.broadcast %cst_41 : f32 to vector<1x256xf32>
    %189 = arith.select %180, %187, %188 : vector<1x256xi1>, vector<1x256xf32>
    %190 = arith.addf %177, %189 : vector<1x256xf32>
    %191 = vector.broadcast %24 : vector<3x1xf32> to vector<3x256xf32>
    %192 = arith.mulf %3, %191 : vector<3x256xf32>
    %193 = vector.broadcast %190 : vector<1x256xf32> to vector<3x256xf32>
    %194 = vector.broadcast %22 : vector<3x1xf32> to vector<3x256xf32>
    %195 = arith.mulf %193, %194 : vector<3x256xf32>
    %196 = arith.addf %192, %195 : vector<3x256xf32>
    %c0_42 = arith.constant 0 : index
    %c0_43 = arith.constant 0 : index
    %197 = vector.load %arg10[%c0_42, %c0_43] : memref<3x256xf32, #tpu.memory_space<vmem>>, vector<3x256xf32>
    tpu.vector_store %arg10[%c0_42, %c0_43], %196 {strides = array<i32>} : memref<3x256xf32, #tpu.memory_space<vmem>>, vector<3x256xf32>,
    return
  }
  func.func @transform_0(%arg0: i32, %arg1: i32, %arg2: memref<3x3xi32, #tpu.memory_space<smem>>) -> (i32, i32) {
    %c0_i32 = arith.constant 0 : i32
    %c0_i32_0 = arith.constant 0 : i32
    return %c0_i32, %arg0 : i32, i32
  }
  func.func @transform_1(%arg0: i32, %arg1: i32, %arg2: memref<3x3xi32, #tpu.memory_space<smem>>) -> (i32, i32) {
    %c0_i32 = arith.constant 0 : i32
    %c0_i32_0 = arith.constant 0 : i32
    return %c0_i32, %arg0 : i32, i32
  }
  func.func @transform_2(%arg0: i32, %arg1: i32, %arg2: memref<3x3xi32, #tpu.memory_space<smem>>) -> (i32, i32, i32) {
    %c0_i32 = arith.constant 0 : i32
    %c0_i32_0 = arith.constant 0 : i32
    %c0_i32_1 = arith.constant 0 : i32
    %c0_i32_2 = arith.constant 0 : i32
    return %c0_i32, %c0_i32_0, %c0_i32_1 : i32, i32, i32
  }
  func.func @transform_3(%arg0: i32, %arg1: i32, %arg2: memref<3x3xi32, #tpu.memory_space<smem>>) -> (i32, i32, i32) {
    %c0_i32 = arith.constant 0 : i32
    %c0_i32_0 = arith.constant 0 : i32
    %c0_i32_1 = arith.constant 0 : i32
    %c0_i32_2 = arith.constant 0 : i32
    return %c0_i32, %c0_i32_0, %c0_i32_1 : i32, i32, i32
  }
  func.func @transform_4(%arg0: i32, %arg1: i32, %arg2: memref<3x3xi32, #tpu.memory_space<smem>>) -> (i32, i32, i32) {
    %c0_i32 = arith.constant 0 : i32
    %c0_i32_0 = arith.constant 0 : i32
    %c0_i32_1 = arith.constant 0 : i32
    %c0_i32_2 = arith.constant 0 : i32
    return %c0_i32, %c0_i32_0, %c0_i32_1 : i32, i32, i32
  }
  func.func @transform_5(%arg0: i32, %arg1: i32, %arg2: memref<3x3xi32, #tpu.memory_space<smem>>) -> (i32, i32, i32) {
    %c0_i32 = arith.constant 0 : i32
    %c0_i32_0 = arith.constant 0 : i32
    %c0_i32_1 = arith.constant 0 : i32
    %c0_i32_2 = arith.constant 0 : i32
    return %c0_i32, %c0_i32_0, %c0_i32_1 : i32, i32, i32
  }
  func.func @transform_6(%arg0: i32, %arg1: i32, %arg2: memref<3x3xi32, #tpu.memory_space<smem>>) -> (i32, i32, i32) {
    %c0_i32 = arith.constant 0 : i32
    %c0_i32_0 = arith.constant 0 : i32
    %c0_i32_1 = arith.constant 0 : i32
    %c0_i32_2 = arith.constant 0 : i32
    return %c0_i32, %c0_i32_0, %c0_i32_1 : i32, i32, i32
  }
  func.func @transform_7(%arg0: i32, %arg1: i32, %arg2: memref<3x3xi32, #tpu.memory_space<smem>>) -> (i32, i32) {
    %c0_i32 = arith.constant 0 : i32
    %c0_i32_0 = arith.constant 0 : i32
    return %c0_i32, %arg0 : i32, i32
  }
}

</mosaic_0001>

<bundles_post_ra>
// kernel: tpu_custom_call.1
= control target key start
LH: loop header
LB: loop body
LE: loop exit
PB: predicated region body
PF: predicated region fallthrough
CT: control target
= control target key end

     0   :  { %s1488_s30 = smov [#allocation3]   ;;  %s1976_s0 = inlined_call_operand.vmem [shape: s32[3,3], index: 0, kind: input, shape index: {}]   ;;  %s1977_s1 = inlined_call_operand.vmem [shape: f32[3,512], index: 1, kind: input, shape index: {}]   ;;  %s1978_s2 = inlined_call_operand.vmem [shape: f32[24,512], index: 2, kind: input, shape index: {}]   ;;  %s1979_s3 = inlined_call_operand.vmem [shape: f32[3,32,2], index: 3, kind: input, shape index: {}]   ;;  %s1980_s4 = inlined_call_operand.vmem [shape: f32[3,32,24], index: 4, kind: input, shape index: {}]   ;;  %s1981_s5 = inlined_call_operand.vmem [shape: f32[3,32,1], index: 5, kind: input, shape index: {}]   ;;  %s1982_s6 = inlined_call_operand.vmem [shape: f32[3,10,32], index: 6, kind: input, shape index: {}]   ;;  %s1983_s7 = inlined_call_operand.vmem [shape: f32[3,10,1], index: 7, kind: input, shape index: {}]   ;;  %s1984_s8 = inlined_call_operand.hbm [shape: f32[3,512], index: 8, kind: output, shape index: {}]  }
   0x1   :  { %1985 = sst [smem:[#allocation9_spill]] %s1978_s2  ;;  %s14_s29 = sshll.u32 %s1976_s0, 4  ;;  %s15_s29 = int_to_ptr.vmem [resolvable:$true] %s14_s29 }
   0x2   :  { %17 = dma.vmem_to_smem %s15_s29, 64, %s1488_s30, [#allocation2] }
   0x3   :  { %1450 = dma.done.wait [#allocation2], 64 }
   0x4   :  { %1451 = vsyncadd [#allocation2], 4294967232 }
   0x5   :  { %20 = sfence }
   0x6   :  { %21 = vsyncpa [#allocation6], 0 }
   0x7   :  { %23 = vsyncpa [#allocation6 + $0x1], 0  ;;  %s1541_s9 = smov 0   ;;  %s1543_s10 = smov 0  }
   0x8   :  { %s1545_s11 = smov 0   ;;  %s1547_s12 = smov 0  }
   0x9   :  { %s1549_s13 = smov 0   ;;  %s1551_s14 = smov 0  }
   0xa   :  { %s1553_s0 = smov 0   ;;  %s1555_s15 = smov 0  }
   0xb LB: > { %s1203_s16 = sadd.s32 4294967295, %s1486_s15   ;;  %s1204_s17 = sadd.s32 4294967294, %s1486_s15   ;;  %s1486_s15 = sphi %s1555_s15, %s29_s15   ;;  %s1482_s0 = sphi %s1553_s0, %s2002_s0   ;;  %s1478_s14 = sphi %s1551_s14, %s2001_s14   ;;  %s1474_s13 = sphi %s1549_s13, %s2000_s13   ;;  %s1470_s12 = sphi %s1547_s12, %s1999_s12   ;;  %s1466_s11 = sphi %s1545_s11, %s1998_s11   ;;  %s1462_s10 = sphi %s1543_s10, %s1997_s10   ;;  %s1458_s9 = sphi %s1541_s9, %s1996_s9  }
   0xc   : > { %s38_s18 = sadd.s32 1, %s1478_s14  ;;  %s41_s19 = sadd.s32 1, %s1482_s0 }
   0xd   : > { %p39_p0 = scmp.ge.s32.totalorder %s38_s18, 3  ;;  %p81_p1 = scmp.ne.s32.totalorder %s1466_s11, %s1462_s10 }
   0xe   : > { %p82_p2 = scmp.eq.s32.totalorder %s1486_s15, 0  ;;  %p216_p4 = scmp.eq.s32.totalorder %s1203_s16, 5 }
   0xf   : > { %s2004_s18 = smov (%p39_p0, %s38_s18), 0  ;;  %s2006_s19 = smov (!%p39_p0, %s41_s19), %s1482_s0 }
  0x10   : > { %p1591_p3 = por %p82_p2, %p81_p1  ;;  %p43_p5 = scmp.ge.s32.totalorder %s2006_s19, 2 }
  0x11   : > { %p221_p6 = scmp.ne.s32.totalorder %s1462_s10, %s1458_s9  ;;  %p1597_p7 = por %p216_p4, %p81_p1 }
  0x12   : > { %p222_p8 = scmp.eq.s32.totalorder %s1204_s17, 5  ;;  %s2008_s19 = smov (%p43_p5, %s2006_s19), 0 }
  0x13   : > { %s71_s23 = ssub.s32 %s1482_s0, %s2008_s19  ;;  %s74_s24 = sadd.s32 1, %s1466_s11 }
  0x14   : > { %p1603_p9 = por %p222_p8, %p221_p6  ;;  %p72_p10 = scmp.eq.s32.totalorder %s71_s23, 0 }
  0x15   : > { %p1206_p11 = scmp.ge.s32.totalorder %s1486_s15, 6 }
  0x16   : > { %s1611_s25 = scalar_select %p72_p10, %s1466_s11, %s74_s24  }
  0x17   : > { %253 = sbr.rel (%p1206_p11) target bundleno = 44 (0x2c), region = 36 }
  0x1c   : > { %265 = sbr.rel (!%p1591_p3) target bundleno = 44 (0x2c), region = 44  ;;  %s267_s26 = sand.u32 (%p1591_p3), 1, %s1466_s11  }
  0x1d   : > { %s1239_s27 = sshll.u32 (%p1591_p3), %s1482_s0, 4  ;;  %s1247_s28 = smul.u32 (%p1591_p3), 48, %s267_s26 }
  0x1e   : > { %s1989_s2 = sld [smem:[#allocation9_spill]] (%p1591_p3) }
  0x1f   : > { %s269_s17 = scalar_lea.vmem (%p1591_p3), [#allocation4], %s1247_s28 }
  0x24   : > { %s272_s16 = scalar_lea.vmem %s1989_s2, %s1239_s27 }
  0x25   : > { %v285_v0 = vld [vmem:[%s272_s16] sm:$0xff]  ;;  %v287_v1 = vld [vmem:[%s272_s16 + $0x8] sm:$0xff] }
  0x26   : > { %v289_v2 = vld [vmem:[%s272_s16 + $0x20] sm:$0xff]  ;;  %286 = vst [vmem:[%s269_s17] sm:$0xff] %v285_v0  ;;  %v291_v3 = vld [vmem:[%s272_s16 + $0x28] sm:$0xff] }
  0x27   : > { %288 = vst [vmem:[%s269_s17 + $0x8] sm:$0xff] %v287_v1  ;;  %v293_v4 = vld [vmem:[%s272_s16 + $0x40] sm:$0xff]  ;;  %v295_v5 = vld [vmem:[%s272_s16 + $0x48] sm:$0xff] }
  0x28   : > { %290 = vst [vmem:[%s269_s17 + $0x10] sm:$0xff] %v289_v2 }
  0x29   : > { %292 = vst [vmem:[%s269_s17 + $0x18] sm:$0xff] %v291_v3 }
  0x2a   : > { %294 = vst [vmem:[%s269_s17 + $0x20] sm:$0xff] %v293_v4 }
  0x2b   : > { %296 = vst [vmem:[%s269_s17 + $0x28] sm:$0xff] %v295_v5 }
  0x2c PF: > { %p1209_p12 = scmp.ge.s32.totalorder %s1486_s15, 1  ;;  %p301_p13 = scmp.lt.s32.totalorder %s1486_s15, 7 }
  0x2e   : > { %p302_p0 = pnand %p1209_p12, %p301_p13 }
  0x2f   : > { %s1624_s20 = sand.u32 (!%p302_p0), 1, %s1462_s10   ;;  %s1211_s23 = sshll.u32 (!%p302_p0), %s1474_s13, 1 }
  0x30   : > { %305 = sbr.rel (%p302_p0) target bundleno = 448 (0x1c0), region = 67  ;;  %s1210_s26 = sshll.u32 (!%p302_p0), %s1624_s20, 3 }
  0x31   : > { %s1248_s24 = smul.u32 (!%p302_p0), 48, %s1624_s20  ;;  %p345_p1 = scmp.lt.s32.totalorder (!%p302_p0), %s1211_s23, 3 }
  0x32   : > { %s1632_s17 = scalar_lea.vmem (!%p302_p0), [#allocation5], %s1210_s26  ;;  %p1213_p2 = scmp.ne.s32.totalorder (!%p302_p0), %s1470_s12, 0 }
  0x33   : > { %s310_s16 = scalar_lea.vmem (!%p302_p0), [#allocation4], %s1248_s24 }
  0x35   : > { %s2010_s23 = smov (!%p345_p1, %s1211_s23), 3  ;;  %355 = sbr.rel (%p1213_p2) target bundleno = 60 (0x3c), region = 75 }
  0x36   : > { %s1212_s27 = sshll.u32 %s2010_s23, 2 }
  0x37   : > { %s348_s30 = scalar_lea.vmem %s1977_s1, %s1212_s27 }
  0x3a   : > { %v356_v6 = vld [vmem:[%s348_s30] sm:$0x77] }
  0x3b   : > { %357 = vst [vmem:[%s1632_s17] sm:$0x77] %v356_v6 }
  0x3c PF: > { %v481_v7 = vld [vmem:[%s310_s16 + $0x20] sm:$0xff]  ;;  %v482_v8 = vld [vmem:[%s310_s16 + $0x28] sm:$0xff]  ;;  %s1637_s2 = sshll.u32 %s1470_s12, 5  ;;  %v479_v9 = vld [vmem:[%s310_s16 + $0x10] sm:$0xff]  ;;  %v1489_v11 = vmov 1   ;;  %v1490_v12 = vmov 0   ;;  %v359_v29 = vlaneseq }
  0x3d   : > { %537 = vmatpush.msra.mxu0 %v481_v7  ;;  %1241 = vmatpush.msra.mxu2 %v481_v7  ;;  %s1643_s26 = scalar_lea.vmem %s1979_s3, %s1637_s2  ;;  %v480_v10 = vld [vmem:[%s310_s16 + $0x18] sm:$0xff]  ;;  %s1650_s29 = scalar_lea.vmem %s1980_s4, %s1637_s2  ;;  %v477_v14 = vld [vmem:[%s310_s16] sm:$0xff]  ;;  %v478_v15 = vld [vmem:[%s310_s16 + $0x8] sm:$0xff]  ;;  %vm511_vm0 = vcmask 195584   ;;  %v1491_v31 = vmov 839922192  }
  0x3e   : > { %566 = vmatpush.msra.mxu1 %v482_v8  ;;  %1244 = vmatpush.msra.mxu3 %v482_v8  ;;  %v471_v13 = vld [vmem:[%s1643_s26 + $0x18] sm:$0xff]  ;;  %v473_v16 = vld [vmem:[%s1650_s29] sm:$0xff]  ;;  %v470_v18 = vld [vmem:[%s1643_s26 + $0x10] sm:$0xff]  ;;  %s614_s23 = scalar_lea.vmem %s1981_s5, %s1637_s2  ;;  %s1227_s2 = sshll.u32 %s1470_s12, 4  ;;  %v1682_v30 = vshrl.u32 %v359_v29, 7  ;;  %v382_v32 = vunpack.c.l.s4 %v1491_v31  ;;  %v1492_v35 = vmov 0.0  }
  0x3f   : > { %1326 = vset.pattern.permute.xlu1 %v1489_v11  ;;  %1325 = vset.pattern.permute.xlu0 %v1490_v12  ;;  %v476_v17 = vld [vmem:[%s1650_s29 + $0x18] sm:$0xff]  ;;  %v469_v19 = vld [vmem:[%s1643_s26 + $0x8] sm:$0xff]  ;;  %v468_v21 = vld [vmem:[%s1643_s26] sm:$0xff]  ;;  %s675_s27 = scalar_lea.vmem %s1983_s7, %s1227_s2  ;;  %s1678_s28 = sshll.u32 %s1470_s12, 7  ;;  %vm393_vm3 = vcmask 1042432   ;;  %vm688_vm12 = vcmask 261120  }
  0x40   : > { %538 = vmatpush.msra.mxu0 %v479_v9  ;;  %1242 = vmatpush.msra.mxu2 %v479_v9  ;;  %v474_v20 = vld [vmem:[%s1650_s29 + $0x8] sm:$0xff]  ;;  %v618_v22 = vld [vmem:[%s614_s23 + $0x18] sm:$0xff]  ;;  %v475_v23 = vld [vmem:[%s1650_s29 + $0x10] sm:$0xff]  ;;  %s362_s29 = sld [smem:[#allocation3 + %s1678_s28]]  ;;  %s363_s30 = sadd.s32 1, %s1678_s28  ;;  %v1685_v34 = vunpack.c.0.s8 %v382_v32 }
  0x41   : > { %567 = vmatpush.msra.mxu1 %v480_v10  ;;  %1245 = vmatpush.msra.mxu3 %v480_v10  ;;  %v617_v24 = vld [vmem:[%s614_s23 + $0x10] sm:$0xff]  ;;  %v615_v25 = vld [vmem:[%s614_s23] sm:$0xff]  ;;  %v616_v27 = vld [vmem:[%s614_s23 + $0x8] sm:$0xff]  ;;  %s364_s16 = sld [smem:[#allocation3 + %s363_s30]]  ;;  %s672_s26 = scalar_lea.vmem %s1982_s6, %s1227_s2 }
  0x42   : > { %595 = vperm.xlu1 %1326, %v471_v13   ;;  %500 = vperm.xlu0 %1325, %v471_v13   ;;  %v676_v26 = vld [vmem:[%s675_s27] sm:$0xff]  ;;  %v677_v28 = vld [vmem:[%s675_s27 + $0x8] sm:$0x3]  ;;  %s365_s12 = sadd.s32 2, %s1678_s28  ;;  %s1240_s27 = sshll.u32 %s1474_s13, 3 }
  0x43   : > { %539 = vmatpush.msra.mxu0 %v477_v14  ;;  %1243 = vmatpush.msra.mxu2 %v477_v14  ;;  %v1690_v38 = vld [vmem:[%s1632_s17] sm:$0x77]  ;;  %s366_s2 = sld [smem:[#allocation3 + %s365_s12]]  ;;  %s1100_s30 = scalar_lea.hbm %s1984_s8, %s1240_s27 }
  0x44   : > { %568 = vmatpush.msra.mxu1 %v478_v15  ;;  %1246 = vmatpush.msra.mxu3 %v478_v15  ;;  %s1102_s13 = sshll.u32 %s1632_s17, 4  ;;  %s1089_s23 = scalar_lea.sflag [#allocation6], %s1624_s20  ;;  %s1103_s13 = int_to_ptr.vmem [resolvable:$true] %s1102_s13 }
  0x45   : > { %1219 = vmatmul.msk.f32.vlgmr.msra.gmra.mxu0 %vm511_vm0, %v473_v16  ;;  %1222 = vmatmul.msk.f32.vlgmr.msra.gmra.mxu2 %vm511_vm0, %v476_v17  ;;  %s1410_s27 = scalar_lea.hbm %s1984_s8, 16 }
  0x46   : > { %1223 = vmatmul.msk.f32.vlgmr.msra.gmra.mxu1 %vm511_vm0, %v473_v16  ;;  %1226 = vmatmul.msk.f32.vlgmr.msra.gmra.mxu3 %vm511_vm0, %v476_v17  ;;  %v367_v33 = vstv %s362_s29 }
  0x47   : > { %1328 = vset.pattern.permute.xlu2 %v1489_v11  ;;  %vm368_vm1 = vcmp.eq.s32.totalorder %v1682_v30, %v367_v33  ;;  %v371_v40 = vstv %s364_s16  ;;  %s1104_s16 = sshll.u32 %s1100_s30, 4  ;;  %s1105_s16 = int_to_ptr.hbm [resolvable:$true] %s1104_s16 }
  0x48   : > { %591 = vperm.xlu2 %1328, %v470_v18   ;;  %v1215_v36 = vsel %vm368_vm1, 1.0, %v1492_v35  ;;  %vm372_vm2 = vcmp.eq.s32.totalorder %v1682_v30, %v371_v40  ;;  %s1404_s24 = sshra.s32 %s1105_s16, 4  ;;  %s1405_s24 = int_to_ptr.hbm [resolvable:$true] %s1404_s24 }
  0x49   : > { %v384_v37 = vperm.slane %v1215_v36, %v1685_v34  ;;  %v1216_v41 = vsel %vm372_vm2, 1.0, %v1492_v35  ;;  %p1411_p6 = scmp.lt.s32.totalorder %s1405_s24, %s1984_s8 }
  0x4a   : > { %1327 = vset.pattern.permute.xlu1 %v1490_v12  ;;  %495 = vperm.xlu0 %1325, %v470_v18   ;;  %v414_v42 = vperm.slane %v1216_v41, %v1685_v34 }
  0x4b   : > { %490 = vperm.xlu1 %1327, %v469_v19   ;;  %v386_v39 = vmul.f32 %v384_v37, %v1690_v38 }
  0x4c   : > { %v416_v43 = vmul.f32 %v414_v42, %v1690_v38 }
  0x4d   : > { %1220 = vmatmul.msk.f32.gmra.mxu0 %vm511_vm0, %v474_v20  ;;  %388 = vst [vmem:[#allocation1] ss:$2 sm:$0xff] %v386_v39 }
  0x4e   : > { %1224 = vmatmul.msk.f32.gmra.mxu1 %vm511_vm0, %v474_v20 }
  0x50   : > { %1329 = vset.pattern.permute.xlu2 %v1490_v12 }
  0x51   : > { %485 = vperm.xlu2 %1329, %v468_v21  }
  0x52   : > { %1330 = vset.pattern.permute.xlu0 %v1489_v11 }
  0x53   : > { %587 = vperm.xlu0 %1330, %v469_v19   ;;  %636 = vperm.xlu1 %1327, %v618_v22  }
  0x54   : > { %v389_v44 = vld.sshfl [vmem:[#allocation1] sm:$0xff pattern:$0x75316420]  ;;  %v390_v45 = vld.sshfl [vmem:[#allocation1 + $0x8] sm:$0xff pattern:$0x75316420] }
  0x55   : > { %1221 = vmatmul.msk.f32.gmra.mxu0 %vm511_vm0, %v475_v23  ;;  %418 = vst [vmem:[#allocation1] ss:$2 sm:$0xff] %v416_v43  ;;  %v394_v48 = vsel %vm393_vm3, %v389_v44, 0.0  ;;  %v401_v49 = vsel %vm393_vm3, %v390_v45, 0.0 }
  0x56   : > { %1225 = vmatmul.msk.f32.gmra.mxu1 %vm511_vm0, %v475_v23  ;;  %v395_v52 = vrot.slane %v394_v48, 4  ;;  %v402_v53 = vrot.slane %v401_v49, 4 }
  0x58   : > { %v396_v56 = vadd.f32 %v395_v52, %v394_v48  ;;  %v403_v57 = vadd.f32 %v402_v53, %v401_v49 }
  0x59   : > { %1331 = vset.pattern.permute.xlu2 %v1489_v11 }
  0x5a   : > { %583 = vperm.xlu2 %1331, %v468_v21   ;;  %v397_v60 = vrot.slane %v396_v56, 2  ;;  %v404_v61 = vrot.slane %v403_v57, 2 }
  0x5b   : > { %1333 = vset.pattern.permute.xlu0 %v1490_v12  ;;  %631 = vperm.xlu1 %1327, %v617_v24  }
  0x5c   : > { %621 = vperm.xlu0 %1333, %v615_v25   ;;  %v419_v46 = vld.sshfl [vmem:[#allocation1] sm:$0xff pattern:$0x75316420]  ;;  %v420_v47 = vld.sshfl [vmem:[#allocation1 + $0x8] sm:$0xff pattern:$0x75316420]  ;;  %v398_v0 = vadd.f32 %v397_v60, %v396_v56  ;;  %v405_v1 = vadd.f32 %v404_v61, %v403_v57 }
  0x5d   : > { %v423_v50 = vsel %vm393_vm3, %v419_v46, 0.0  ;;  %v430_v51 = vsel %vm393_vm3, %v420_v47, 0.0 }
  0x5e   : > { %v424_v54 = vrot.slane %v423_v50, 4  ;;  %v431_v55 = vrot.slane %v430_v51, 4  ;;  %v399_v6 = vrot.slane %v398_v0, 1  ;;  %v406_v7 = vrot.slane %v405_v1, 1 }
  0x60   : > { %v425_v58 = vadd.f32 %v424_v54, %v423_v50  ;;  %v432_v59 = vadd.f32 %v431_v55, %v430_v51  ;;  %v400_v11 = vadd.f32 %v399_v6, %v398_v0 }
  0x62   : > { %1332 = vset.pattern.permute.xlu2 %v1490_v12  ;;  %v426_v62 = vrot.slane %v425_v58, 2  ;;  %v433_v63 = vrot.slane %v432_v59, 2  ;;  %v407_v12 = vadd.f32 %v406_v7, %v405_v1  ;;  %1334 = vtanh.f32 %v400_v11 }
  0x63   : > { %680 = vperm.xlu1 %1327, %v676_v26   ;;  %626 = vperm.xlu2 %1332, %v616_v27  }
  0x64   : > { %v427_v2 = vadd.f32 %v426_v62, %v425_v58  ;;  %v434_v4 = vadd.f32 %v433_v63, %v432_v59  ;;  %1336 = vtanh.f32 %v407_v12 }
  0x66   : > { %v428_v8 = vrot.slane %v427_v2, 1  ;;  %v435_v10 = vrot.slane %v434_v4, 1 }
  0x68   : > { %v429_v13 = vadd.f32 %v428_v8, %v427_v2  ;;  %v436_v14 = vadd.f32 %v435_v10, %v434_v4  ;;  %v1335_v20 = vpop.eup %1334 }
  0x6a   : > { %1338 = vtanh.f32 %v429_v13  ;;  %v1337_v21 = vpop.eup %1336 }
  0x6b   : > { %685 = vperm.xlu2 %1332, %v677_v28   ;;  %1340 = vtanh.f32 %v436_v14 }
  0x70   : > { %v1339_v22 = vpop.eup %1338 }
  0x71   : > { %v1341_v23 = vpop.eup %1340 }
  0xa2   : > { %v1701_v3 = vpop.permute.xlu2 %591 }
  0xa3   : > { %v602_v4 = vmul.f32 %v1339_v22, %v1701_v3  ;;  %v603_v7 = vmul.f32 %v1341_v23, %v1701_v3 }
  0xab   : > { %v486_v15 = vpop.permute.xlu2 %485 }
  0xac   : > { %v503_v45 = vmul.f32 %v1335_v20, %v486_v15  ;;  %v504_v49 = vmul.f32 %v1337_v21, %v486_v15 }
  0xb4   : > { %v501_v5 = vpop.permute.xlu0 %500  ;;  %v596_v9 = vpop.permute.xlu1 %595 }
  0xb5   : > { %v509_v24 = vmul.f32 %v1335_v20, %v501_v5  ;;  %v510_v25 = vmul.f32 %v1337_v21, %v501_v5  ;;  %v604_v27 = vmul.f32 %v1339_v22, %v596_v9  ;;  %v584_v28 = vpop.permute.xlu2 %583  ;;  %v605_v32 = vmul.f32 %v1341_v23, %v596_v9 }
  0xb6   : > { %v598_v53 = vmul.f32 %v1339_v22, %v584_v28  ;;  %v599_v54 = vmul.f32 %v1341_v23, %v584_v28 }
  0xbc   : > { %v496_v16 = vpop.permute.xlu0 %495 }
  0xbd   : > { %v491_v17 = vpop.permute.xlu1 %490  ;;  %v507_v57 = vmul.f32 %v1335_v20, %v496_v16  ;;  %v508_v58 = vmul.f32 %v1337_v21, %v496_v16  ;;  %v627_v63 = vpop.permute.xlu2 %626 }
  0xbe   : > { %v505_v39 = vmul.f32 %v1335_v20, %v491_v17  ;;  %v506_v42 = vmul.f32 %v1337_v21, %v491_v17 }
  0xc2   : > { %v541_v18 = vpop.f32.mrf.mxu0 }
  0xc3   : > { %v570_v19 = vpop.f32.mrf.mxu1  ;;  %v542_v59 = vadd.f32 %v541_v18, %v503_v45 }
  0xc4   : > { %v571_v61 = vadd.f32 %v570_v19, %v504_v49 }
  0xc5   : > { %v588_v33 = vpop.permute.xlu0 %587  ;;  %v637_v43 = vpop.permute.xlu1 %636  ;;  %v606_v10 = vadd.f32 %v598_v53, %v542_v59 }
  0xc6   : > { %v600_v46 = vmul.f32 %v1339_v22, %v588_v33  ;;  %v601_v50 = vmul.f32 %v1341_v23, %v588_v33  ;;  %v607_v14 = vadd.f32 %v599_v54, %v571_v61 }
  0xc8   : > { %v550_v26 = vpop.f32.mrf.mxu2 }
  0xc9   : > { %v551_v29 = vadd.f32 %v550_v26, %v509_v24  ;;  %v579_v31 = vpop.f32.mrf.mxu3 }
  0xca   : > { %v580_v36 = vadd.f32 %v579_v31, %v510_v25  ;;  %v544_v37 = vpop.f32.mrf.mxu0  ;;  %v673_v31 = vld [vmem:[%s672_s26] sm:$0xff] }
  0xcb   : > { %v612_v40 = vadd.f32 %v604_v27, %v551_v29  ;;  %v573_v41 = vpop.f32.mrf.mxu1  ;;  %v545_v48 = vadd.f32 %v544_v37, %v505_v39  ;;  %v375_v37 = vstv %s366_s2 }
  0xcc   : > { %v613_v44 = vadd.f32 %v605_v32, %v580_v36  ;;  %v574_v52 = vadd.f32 %v573_v41, %v506_v42  ;;  %v674_v36 = vld [vmem:[%s672_s26 + $0x8] sm:$0x3]  ;;  %vm376_vm13 = vcmp.eq.s32.totalorder %v1682_v30, %v375_v37  ;;  %s1406_s26 = scalar_lea.hbm %s1405_s24, 8 }
  0xcd   : > { %v645_v47 = vadd.f32 %v637_v43, %v612_v40  ;;  %v608_v60 = vadd.f32 %v600_v46, %v545_v48  ;;  %v632_v13 = vpop.permute.xlu1 %631  ;;  %v1713_v39 = vsel %vm376_vm13, 1.0, %v1492_v35  ;;  %p1407_p3 = scmp.ne.s32.totalorder %s1405_s24, %s1406_s26  ;;  %p1412_p8 = scmp.lt.s32.totalorder %s1410_s27, %s1406_s26 }
  0xce   : > { %v646_v51 = vadd.f32 %v637_v43, %v613_v44  ;;  %v609_v62 = vadd.f32 %v601_v50, %v574_v52  ;;  %v622_v8 = vpop.permute.xlu0 %621  ;;  %v443_v40 = vperm.slane %v1713_v39, %v1685_v34 }
  0xcf   : > { %vm653_vm4 = vcmp.gt.f32.partialorder %v645_v47, 0.0  ;;  %v661_v55 = vmul.f32 0.01, %v645_v47  ;;  %v641_v11 = vadd.f32 %v627_v63, %v608_v60  ;;  %v639_v17 = vadd.f32 %v622_v8, %v606_v10  ;;  %p1408_p4 = pnand %p1407_p3, %p1597_p7  ;;  %p1413_p10 = por %p1412_p8, %p1411_p6 }
  0xd0   : > { %vm654_vm5 = vcmp.gt.f32.partialorder %v646_v51, 0.0  ;;  %v662_v56 = vmul.f32 0.01, %v646_v51  ;;  %v642_v15 = vadd.f32 %v627_v63, %v609_v62  ;;  %v640_v19 = vadd.f32 %v622_v8, %v607_v14 }
  0xd1   : > { %v669_v1 = vsel %vm653_vm4, %v645_v47, %v661_v55  ;;  %v657_v22 = vmul.f32 0.01, %v641_v11  ;;  %vm649_vm8 = vcmp.gt.f32.partialorder %v641_v11, 0.0  ;;  %v655_v25 = vmul.f32 0.01, %v639_v17  ;;  %p1409_p5 = pneg %p1408_p4 }
  0xd2   : > { %v547_v0 = vpop.f32.mrf.mxu0  ;;  %v670_v2 = vsel %vm654_vm5, %v646_v51, %v662_v56  ;;  %707 = vmatpush.msrb.mxu2 %v669_v1  ;;  %v658_v3 = vmul.f32 0.01, %v642_v15  ;;  %vm650_vm9 = vcmp.gt.f32.partialorder %v642_v15, 0.0  ;;  %vm647_vm10 = vcmp.gt.f32.partialorder %v639_v17, 0.0  ;;  %v686_v51 = vpop.permute.xlu2 %685 }
  0xd3   : > { %v548_v5 = vadd.f32 %v547_v0, %v507_v57  ;;  %v576_v6 = vpop.f32.mrf.mxu1  ;;  %730 = vmatpush.msrb.mxu3 %v670_v2  ;;  %v656_v27 = vmul.f32 0.01, %v640_v19  ;;  %v665_v28 = vsel %vm649_vm8, %v641_v11, %v657_v22  ;;  %vm648_vm11 = vcmp.gt.f32.partialorder %v640_v19, 0.0  ;;  %p1414_p11 = pnand %p1413_p10, %p1409_p5 }
  0xd4   : > { %v577_v9 = vadd.f32 %v576_v6, %v508_v58  ;;  %v666_v29 = vsel %vm650_vm9, %v642_v15, %v658_v3  ;;  %v663_v32 = vsel %vm647_vm10, %v639_v17, %v655_v25  ;;  %v445_v41 = vmul.f32 %v443_v40, %v1690_v38 }
  0xd5   : > { %v610_v12 = vadd.f32 %v602_v4, %v548_v5  ;;  %v664_v33 = vsel %vm648_vm11, %v640_v19, %v656_v27  ;;  %v681_v42 = vpop.permute.xlu1 %680 }
  0xd6   : > { %v611_v16 = vadd.f32 %v603_v7, %v577_v9  ;;  %447 = vst [vmem:[#allocation1] ss:$2 sm:$0xff] %v445_v41 }
  0xd7   : > { %v643_v18 = vadd.f32 %v632_v13, %v610_v12 }
  0xd8   : > { %v644_v20 = vadd.f32 %v632_v13, %v611_v16 }
  0xd9   : > { %vm651_vm6 = vcmp.gt.f32.partialorder %v643_v18, 0.0  ;;  %v659_v21 = vmul.f32 0.01, %v643_v18 }
  0xda   : > { %vm652_vm7 = vcmp.gt.f32.partialorder %v644_v20, 0.0  ;;  %v660_v24 = vmul.f32 0.01, %v644_v20 }
  0xdb   : > { %v667_v23 = vsel %vm651_vm6, %v643_v18, %v659_v21 }
  0xdc   : > { %708 = vmatpush.msrb.mxu2 %v667_v23  ;;  %v668_v26 = vsel %vm652_vm7, %v644_v20, %v660_v24 }
  0xdd   : > { %731 = vmatpush.msrb.mxu3 %v668_v26  ;;  %v448_v49 = vld.sshfl [vmem:[#allocation1] sm:$0xff pattern:$0x75316420]  ;;  %v449_v54 = vld.sshfl [vmem:[#allocation1 + $0x8] sm:$0xff pattern:$0x75316420] }
  0xde   : > { %709 = vmatpush.msrb.mxu2 %v665_v28  ;;  %v452_v35 = vsel %vm393_vm3, %v448_v49, 0.0  ;;  %v459_v59 = vsel %vm393_vm3, %v449_v54, 0.0 }
  0xdf   : > { %732 = vmatpush.msrb.mxu3 %v666_v29  ;;  %v453_v56 = vrot.slane %v452_v35, 4  ;;  %v460_v6 = vrot.slane %v459_v59, 4 }
  0xe0   : > { %710 = vmatpush.msrb.mxu2 %v663_v32 }
  0xe1   : > { %733 = vmatpush.msrb.mxu3 %v664_v33  ;;  %1228 = vmatmul.msk.f32.vlgmr.msrb.gmra.mxu2 %vm688_vm12, %v673_v31  ;;  %v454_v1 = vadd.f32 %v453_v56, %v452_v35  ;;  %v461_v10 = vadd.f32 %v460_v6, %v459_v59 }
  0xe2   : > { %1230 = vmatmul.msk.f32.vlgmr.msrb.gmra.mxu3 %vm688_vm12, %v673_v31 }
  0xe3   : > { %v455_v8 = vrot.slane %v454_v1, 2  ;;  %v462_v22 = vrot.slane %v461_v10, 2 }
  0xe5   : > { %v456_v16 = vadd.f32 %v455_v8, %v454_v1  ;;  %v463_v41 = vadd.f32 %v462_v22, %v461_v10 }
  0xe7   : > { %v457_v37 = vrot.slane %v456_v16, 1 }
  0xe9   : > { %1229 = vmatmul.msk.f32.gmra.mxu2 %vm688_vm12, %v674_v36 }
  0xea   : > { %1231 = vmatmul.msk.f32.gmra.mxu3 %vm688_vm12, %v674_v36 }
 0x164   : > { %v712_v43 = vpop.f32.mrf.mxu2 }
 0x165   : > { %v713_v44 = vadd.f32 %v712_v43, %v681_v42  ;;  %v735_v45 = vpop.f32.mrf.mxu3 }
 0x166   : > { %v1718_v46 = vadd.f32 %v735_v45, %v681_v42 }
 0x167   : > { %v745_v47 = vmin.f32 %v713_v44, 20.0  ;;  %vm741_vm15 = vcmp.gt.f32.partialorder %v713_v44, 20.0 }
 0x168   : > { %v746_v48 = vmin.f32 %v1718_v46, 20.0  ;;  %vm742_vm1 = vcmp.gt.f32.partialorder %v1718_v46, 20.0 }
 0x169   : > { %v749_v30 = vmul.f32 1.442695, %v745_v47 }
 0x16a   : > { %v751_v50 = vmul.f32 1.442695, %v746_v48 }
 0x16b   : > { %1342 = vpow2.f32 %v749_v30 }
 0x16c   : > { %1344 = vpow2.f32 %v751_v50  ;;  %v715_v52 = vpop.f32.mrf.mxu2 }
 0x16d   : > { %v1722_v53 = vadd.f32 %v715_v52, %v686_v51  ;;  %v738_v55 = vpop.f32.mrf.mxu3  ;;  %v464_v52 = vrot.slane %v463_v41, 1 }
 0x16e   : > { %v1724_v57 = vadd.f32 %v738_v55, %v686_v51  ;;  %v458_v51 = vadd.f32 %v457_v37, %v456_v16 }
 0x16f   : > { %v747_v58 = vmin.f32 %v1722_v53, 20.0  ;;  %vm743_vm3 = vcmp.gt.f32.partialorder %v1722_v53, 20.0 }
 0x170   : > { %v748_v60 = vmin.f32 %v1724_v57, 20.0  ;;  %vm744_vm5 = vcmp.gt.f32.partialorder %v1724_v57, 20.0 }
 0x171   : > { %v1343_v61 = vpop.eup %1342  ;;  %v753_v62 = vmul.f32 1.442695, %v747_v58 }
 0x172   : > { %v1345_v63 = vpop.eup %1344  ;;  %v757_v0 = vadd.f32 1.0, %v1343_v61  ;;  %v755_v2 = vmul.f32 1.442695, %v748_v60  ;;  %v760_v4 = vmul.f32 -0.5, %v1343_v61  ;;  %v763_v11 = vand.u32 2147483647, %v1343_v61 }
 0x173   : > { %v766_v5 = vadd.f32 1.0, %v1345_v63  ;;  %1346 = vpow2.f32 %v753_v62  ;;  %v769_v7 = vmul.f32 -0.5, %v1345_v63  ;;  %v772_v14 = vand.u32 2147483647, %v1345_v63 }
 0x174   : > { %1348 = vlog2.f32 %v757_v0  ;;  %v761_v9 = vadd.f32 1.0, %v760_v4  ;;  %vm764_vm14 = vcmp.lt.f32.partialorder %v763_v11, 0.0004427343 }
 0x175   : > { %1350 = vlog2.f32 %v766_v5  ;;  %v770_v12 = vadd.f32 1.0, %v769_v7  ;;  %vm773_vm0 = vcmp.lt.f32.partialorder %v772_v14, 0.0004427343 }
 0x176   : > { %1352 = vpow2.f32 %v755_v2  ;;  %v762_v20 = vmul.f32 %v1343_v61, %v761_v9 }
 0x177   : > { %v771_v23 = vmul.f32 %v1345_v63, %v770_v12 }
 0x179   : > { %v1347_v13 = vpop.eup %1346 }
 0x17a   : > { %v1349_v15 = vpop.eup %1348  ;;  %v775_v17 = vadd.f32 1.0, %v1347_v13  ;;  %v778_v21 = vmul.f32 -0.5, %v1347_v13  ;;  %v781_v40 = vand.u32 2147483647, %v1347_v13 }
 0x17b   : > { %v1351_v18 = vpop.eup %1350  ;;  %v759_v19 = vmul.f32 0.6931472, %v1349_v15  ;;  %v465_v15 = vadd.f32 %v464_v52, %v463_v41 }
 0x17c   : > { %v1353_v24 = vpop.eup %1352  ;;  %v768_v3 = vmul.f32 0.6931472, %v1351_v18  ;;  %1354 = vlog2.f32 %v775_v17  ;;  %v779_v33 = vadd.f32 1.0, %v778_v21  ;;  %vm782_vm2 = vcmp.lt.f32.partialorder %v781_v40, 0.0004427343 }
 0x17d   : > { %v765_v25 = vsel %vm764_vm14, %v762_v20, %v759_v19  ;;  %v784_v26 = vadd.f32 1.0, %v1353_v24  ;;  %v787_v29 = vmul.f32 -0.5, %v1353_v24 }
 0x17e   : > { %v793_v27 = vsel %vm741_vm15, %v713_v44, %v765_v25  ;;  %v774_v28 = vsel %vm773_vm0, %v771_v23, %v768_v3  ;;  %v790_v44 = vand.u32 2147483647, %v1353_v24 }
 0x17f   : > { %v1730_v31 = vadd.f32 0.001, %v793_v27  ;;  %v794_v32 = vsel %vm742_vm1, %v1718_v46, %v774_v28  ;;  %1356 = vlog2.f32 %v784_v26  ;;  %v788_v47 = vadd.f32 1.0, %v787_v29 }
 0x180   : > { %v1733_v36 = vadd.f32 0.001, %v794_v32  ;;  %v780_v46 = vmul.f32 %v1347_v13, %v779_v33  ;;  %vm1746_vm4 = vcmp.lt.f32.partialorder %v790_v44, 0.0004427343 }
 0x181   : > { %v803_v42 = vsub.f32 0.0, %v1730_v31  ;;  %v807_v43 = vrot.slane %v1730_v31, 7  ;;  %v813_v35 = vrot.slane %v1730_v31, 1  ;;  %v789_v61 = vmul.f32 %v1353_v24, %v788_v47 }
 0x182   : > { %v1355_v45 = vpop.eup %1354  ;;  %v804_v48 = vsub.f32 0.0, %v1733_v36  ;;  %v808_v49 = vrot.slane %v1733_v36, 7  ;;  %v814_v10 = vrot.slane %v1733_v36, 1 }
 0x183   : > { %v777_v30 = vmul.f32 0.6931472, %v1355_v45  ;;  %v1739_v50 = vsub.f32 %v803_v42, %v807_v43  ;;  %v1754_v0 = vadd.f32 %v813_v35, %v1730_v31  ;;  %v1759_v4 = vrot.slane %v803_v42, 7 }
 0x184   : > { %v1751_v62 = vsub.f32 %v804_v48, %v808_v49  ;;  %v1777_v19 = vadd.f32 %v814_v10, %v1733_v36  ;;  %v1781_v22 = vrot.slane %v804_v48, 7 }
 0x185   : > { %v1357_v54 = vpop.eup %1356  ;;  %v783_v55 = vsel %vm782_vm2, %v780_v46, %v777_v30  ;;  %v1744_v56 = vadd.f32 -10000.0, %v1739_v50  ;;  %v913_v5 = vsub.f32 %v803_v42, %v1739_v50  ;;  %v1771_v12 = vadd.f32 10000.0, %v1754_v0 }
 0x186   : > { %v795_v59 = vsel %vm743_vm3, %v1722_v53, %v783_v55  ;;  %v786_v60 = vmul.f32 0.6931472, %v1357_v54  ;;  %v1768_v11 = vadd.f32 -10000.0, %v1751_v62  ;;  %v953_v14 = vsub.f32 %v1730_v31, %v1759_v4 }
 0x187   : > { %v799_v63 = vadd.f32 0.001, %v795_v59  ;;  %v835_v1 = vmul.f32 0.99, %v1744_v56  ;;  %v869_v2 = vsub.f32 %v1739_v50, %v1744_v56  ;;  %v837_v20 = vmul.f32 0.99, %v1771_v12 }
 0x188   : > { %v792_v53 = vsel %vm1746_vm4, %v789_v61, %v786_v60  ;;  %v1786_v27 = vadd.f32 10000.0, %v1777_v19  ;;  %v870_v28 = vsub.f32 %v1751_v62, %v1768_v11  ;;  %v851_v29 = vrot.slane %v1744_v56, 7 }
 0x189   : > { %v801_v6 = vmul.f32 2.0, %v799_v63  ;;  %v839_v7 = vmax.f32 %v835_v1, %v458_v51  ;;  %v796_v8 = vsel %vm744_vm5, %v1724_v57, %v792_v53  ;;  %1358 = vrcp.f32 %v869_v2 }
 0x18a   : > { %v800_v9 = vadd.f32 0.001, %v796_v8  ;;  %1360 = vrcp.f32 %v913_v5  ;;  %v836_v57 = vmul.f32 0.99, %v1768_v11  ;;  %v1792_v32 = vrot.slane %v1739_v50, 7 }
 0x18b   : > { %v823_v13 = vmul.f32 10000.0, %v801_v6  ;;  %v843_v17 = vrot.slane %v839_v7, 7  ;;  %1362 = vrcp.f32 %v953_v14  ;;  %v1035_v33 = vsub.f32 %v1771_v12, %v1754_v0 }
 0x18c   : > { %v802_v18 = vmul.f32 2.0, %v800_v9  ;;  %v840_v25 = vmax.f32 %v836_v57, %v465_v15  ;;  %v914_v41 = vsub.f32 %v804_v48, %v1751_v62  ;;  %v954_v42 = vsub.f32 %v1733_v36, %v1781_v22 }
 0x18d   : > { %v827_v16 = vrot.slane %v823_v13, 3  ;;  %v1783_v3 = vmin.f32 %v837_v20, %v843_v17  ;;  %v838_v30 = vmul.f32 0.99, %v1786_v27  ;;  %1364 = vrcp.f32 %v870_v28 }
 0x18e   : > { %v824_v23 = vmul.f32 10000.0, %v802_v18  ;;  %v844_v47 = vrot.slane %v840_v25, 7  ;;  %1366 = vrcp.f32 %v1035_v33  ;;  %v852_v52 = vrot.slane %v1768_v11, 7 }
 0x18f   : > { %v833_v21 = vsub.f32 %v1739_v50, %v827_v16  ;;  %v1359_v24 = vpop.eup %1358  ;;  %v925_v44 = vsub.f32 %v1783_v3, %v1792_v32  ;;  %v881_v49 = vsub.f32 %v1783_v3, %v851_v29  ;;  %1368 = vrcp.f32 %v914_v41 }
 0x190   : > { %v1361_v26 = vpop.eup %1360  ;;  %v875_v40 = vrot.slane %v1359_v24, 4  ;;  %v828_v45 = vrot.slane %v824_v23, 3  ;;  %v1805_v48 = vmin.f32 %v838_v30, %v844_v47  ;;  %v831_v54 = vadd.f32 %v827_v16, %v1754_v0 }
 0x191   : > { %v867_v37 = vsub.f32 %v1739_v50, %v833_v21  ;;  %v919_v43 = vrot.slane %v1361_v26, 4  ;;  %v1363_v46 = vpop.eup %1362  ;;  %v929_v56 = vrot.slane %v925_v44, 5  ;;  %1370 = vrcp.f32 %v954_v42 }
 0x192   : > { %v834_v35 = vsub.f32 %v1751_v62, %v828_v45  ;;  %v885_v58 = vrot.slane %v881_v49, 5  ;;  %v959_v59 = vrot.slane %v1363_v46, 4  ;;  %v965_v60 = vsub.f32 %v1783_v3, %v1759_v4 }
 0x193   : > { %v879_v51 = vmul.f32 %v875_v40, %v867_v37  ;;  %v923_v55 = vmul.f32 %v919_v43, %v913_v5  ;;  %v1812_v61 = vrot.slane %v1751_v62, 7  ;;  %v882_v1 = vsub.f32 %v1805_v48, %v852_v52  ;;  %v1365_v5 = vpop.eup %1364 }
 0x194   : > { %v868_v63 = vsub.f32 %v1751_v62, %v834_v35  ;;  %v1036_v2 = vsub.f32 %v1786_v27, %v1777_v19  ;;  %vm1821_vm6 = vcmp.ge.f32.partialorder %v1783_v3, %v851_v29  ;;  %vm863_vm7 = vcmp.lt.f32.partialorder %v1783_v3, %v1792_v32  ;;  %v1367_v8 = vpop.eup %1366 }
 0x195   : > { %v889_v6 = vmul.f32 %v885_v58, %v879_v51  ;;  %v926_v7 = vsub.f32 %v1805_v48, %v1812_v61  ;;  %vm901_vm8 = vcmp.ge.f32.partialorder %v1783_v3, %v1792_v32  ;;  %v933_v9 = vmul.f32 %v929_v56, %v923_v55  ;;  %v1369_v15 = vpop.eup %1368  ;;  %vm865_vm11 = vmand %vm1821_vm6, %vm863_vm7 }
 0x196   : > { %v1033_v10 = vsub.f32 %v831_v54, %v1754_v0  ;;  %v876_v13 = vrot.slane %v1365_v5, 4  ;;  %v963_v16 = vmul.f32 %v959_v59, %v953_v14  ;;  %v969_v17 = vrot.slane %v965_v60, 4 }
 0x197   : > { %v886_v18 = vrot.slane %v882_v1, 5  ;;  %v966_v57 = vsub.f32 %v1805_v48, %v1781_v22  ;;  %v1371_v20 = vpop.eup %1370  ;;  %v920_v23 = vrot.slane %v1369_v15, 4  ;;  %v930_v25 = vrot.slane %v926_v7, 5 }
 0x198   : > { %v880_v24 = vmul.f32 %v876_v13, %v868_v63  ;;  %1372 = vrcp.f32 %v1036_v2  ;;  %v891_v26 = vadd.f32 %v889_v6, %v833_v21  ;;  %v1041_v28 = vrot.slane %v1367_v8, 4 }
 0x199   : > { %v832_v29 = vadd.f32 %v828_v45, %v1777_v19  ;;  %v960_v33 = vrot.slane %v1371_v20, 4  ;;  %v935_v37 = vadd.f32 %v933_v9, %v1739_v50  ;;  %v1047_v14 = vsub.f32 %v1783_v3, %v1754_v0 }
 0x19a   : > { %v890_v40 = vmul.f32 %v886_v18, %v880_v24  ;;  %v924_v43 = vmul.f32 %v920_v23, %v914_v41  ;;  %vm909_vm9 = vcmp.lt.f32.partialorder %v1783_v3, %v1759_v4  ;;  %v970_v47 = vrot.slane %v966_v57, 4 }
 0x19b   : > { %v964_v44 = vmul.f32 %v960_v33, %v954_v42  ;;  %v993_v49 = vsub.f32 %v1754_v0, %v1730_v31  ;;  %vm947_vm10 = vcmp.ge.f32.partialorder %v1783_v3, %v1759_v4  ;;  %v973_v21 = vmul.f32 %v969_v17, %v963_v16  ;;  %vm911_vm14 = vmand %vm901_vm8, %vm909_vm9 }
 0x19c   : > { %v934_v45 = vmul.f32 %v930_v25, %v924_v43  ;;  %v994_v50 = vsub.f32 %v1777_v19, %v1733_v36  ;;  %v895_v30 = vrot.slane %v891_v26, 3  ;;  %v892_v46 = vadd.f32 %v890_v40, %v834_v35 }
 0x19d   : > { %v1034_v41 = vsub.f32 %v832_v29, %v1777_v19  ;;  %1374 = vrcp.f32 %v993_v49  ;;  %v939_v54 = vrot.slane %v935_v37, 3  ;;  %v1045_v42 = vmul.f32 %v1041_v28, %v1033_v10 }
 0x19e   : > { %v1373_v51 = vpop.eup %1372  ;;  %v1051_v55 = vrot.slane %v1047_v14, 4  ;;  %1376 = vrcp.f32 %v994_v50  ;;  %v936_v56 = vadd.f32 %v934_v45, %v1751_v62  ;;  %v974_v58 = vmul.f32 %v970_v47, %v964_v44 }
 0x19f   : > { %v1042_v59 = vrot.slane %v1373_v51, 4  ;;  %v1048_v60 = vsub.f32 %v1805_v48, %v1777_v19  ;;  %v975_v35 = vadd.f32 %v973_v21, %v1759_v4  ;;  %vm1859_vm12 = vcmp.ge.f32.partialorder %v1805_v48, %v852_v52 }
 0x1a0   : > { %vm864_vm13 = vcmp.lt.f32.partialorder %v1805_v48, %v1812_v61  ;;  %v1005_v62 = vsub.f32 %v1783_v3, %v1730_v31  ;;  %v899_v1 = vsel %vm865_vm11, %v895_v30, 0.0  ;;  %v896_v11 = vrot.slane %v892_v46, 3 }
 0x1a1   : > { %v1046_v2 = vmul.f32 %v1042_v59, %v1034_v41  ;;  %v1006_v52 = vsub.f32 %v1805_v48, %v1733_v36  ;;  %v943_v5 = vsel %vm911_vm14, %v939_v54, 0.0  ;;  %vm949_vm15 = vcmp.lt.f32.partialorder %v1783_v3, %v1730_v31  ;;  %vm866_vm2 = vmand %vm1859_vm12, %vm864_vm13 }
 0x1a2   : > { %v1055_v53 = vmul.f32 %v1051_v55, %v1045_v42  ;;  %vm902_vm0 = vcmp.ge.f32.partialorder %v1805_v48, %v1812_v61  ;;  %vm910_vm1 = vcmp.lt.f32.partialorder %v1805_v48, %v1781_v22  ;;  %v940_v7 = vrot.slane %v936_v56, 3  ;;  %vm951_vm5 = vmand %vm947_vm10, %vm949_vm15 }
 0x1a3   : > { %v1375_v6 = vpop.eup %1374  ;;  %v976_v32 = vadd.f32 %v974_v58, %v1781_v22  ;;  %v1052_v8 = vrot.slane %v1048_v60, 4  ;;  %v945_v10 = vadd.f32 %v943_v5, %v899_v1  ;;  %v979_v13 = vrot.slane %v975_v35, 4  ;;  %vm912_vm3 = vmand %vm902_vm0, %vm910_vm1 }
 0x1a4   : > { %v1377_v9 = vpop.eup %1376  ;;  %v999_v15 = vrot.slane %v1375_v6, 4  ;;  %v1009_v16 = vrot.slane %v1005_v62, 4  ;;  %v900_v17 = vsel %vm866_vm2, %v896_v11, 0.0  ;;  %v1010_v20 = vrot.slane %v1006_v52, 4 }
 0x1a5   : > { %v1056_v18 = vmul.f32 %v1052_v8, %v1046_v2  ;;  %v1000_v57 = vrot.slane %v1377_v9, 4  ;;  %vm948_vm4 = vcmp.ge.f32.partialorder %v1805_v48, %v1781_v22  ;;  %v944_v23 = vsel %vm912_vm3, %v940_v7, 0.0 }
 0x1a6   : > { %v1003_v24 = vmul.f32 %v999_v15, %v993_v49  ;;  %vm950_vm6 = vcmp.lt.f32.partialorder %v1805_v48, %v1733_v36  ;;  %v980_v25 = vrot.slane %v976_v32, 4  ;;  %v983_v28 = vsel %vm951_vm5, %v979_v13, 0.0 }
 0x1a7   : > { %v1004_v26 = vmul.f32 %v1000_v57, %v994_v50  ;;  %v1057_v61 = vadd.f32 %v1055_v53, %v1754_v0  ;;  %v946_v29 = vadd.f32 %v944_v23, %v900_v17  ;;  %v985_v22 = vadd.f32 %v983_v28, %v945_v10  ;;  %vm952_vm7 = vmand %vm948_vm4, %vm950_vm6 }
 0x1a8   : > { %v1013_v33 = vmul.f32 %v1009_v16, %v1003_v24  ;;  %v1058_v37 = vadd.f32 %v1056_v18, %v1777_v19  ;;  %vm987_vm8 = vcmp.ge.f32.partialorder %v1783_v3, %v1730_v31  ;;  %vm988_vm9 = vcmp.ge.f32.partialorder %v1805_v48, %v1733_v36 }
 0x1a9   : > { %v1014_v14 = vmul.f32 %v1010_v20, %v1004_v26  ;;  %vm989_vm10 = vcmp.lt.f32.partialorder %v1783_v3, %v1754_v0  ;;  %v984_v40 = vsel %vm952_vm7, %v980_v25, 0.0  ;;  %vm990_vm11 = vcmp.lt.f32.partialorder %v1805_v48, %v1777_v19 }
 0x1aa   : > { %v1015_v4 = vadd.f32 %v1013_v33, %v1730_v31  ;;  %vm1027_vm12 = vcmp.ge.f32.partialorder %v1783_v3, %v1754_v0  ;;  %v986_v44 = vadd.f32 %v984_v40, %v946_v29  ;;  %vm1029_vm13 = vcmp.lt.f32.partialorder %v1783_v3, %v1771_v12  ;;  %vm991_vm14 = vmand %vm987_vm8, %vm989_vm10 }
 0x1ab   : > { %v1016_v43 = vadd.f32 %v1014_v14, %v1733_v36  ;;  %v1061_v49 = vrot.slane %v1057_v61, 4  ;;  %vm1028_vm15 = vcmp.ge.f32.partialorder %v1805_v48, %v1777_v19  ;;  %vm1030_vm0 = vcmp.lt.f32.partialorder %v1805_v48, %v1786_v27  ;;  %vm992_vm1 = vmand %vm988_vm9, %vm990_vm11 }
 0x1ac   : > { %v1019_v47 = vrot.slane %v1015_v4, 4  ;;  %v1062_v31 = vrot.slane %v1058_v37, 4  ;;  %v379_v50 = vsub.f32 1.0, %v1713_v39  ;;  %vm1031_vm2 = vmand %vm1027_vm12, %vm1029_vm13  ;;  %vm1083_vm4 = vcmask 1043456  }
 0x1ad   : > { %v1020_v21 = vrot.slane %v1016_v43, 4  ;;  %vm1032_vm3 = vmand %vm1028_vm15, %vm1030_vm0  ;;  %v1065_v19 = vsel %vm1031_vm2, %v1061_v49, 0.0 }
 0x1ae   : > { %v1023_v45 = vsel %vm991_vm14, %v1019_v47, 0.0  ;;  %v1066_v41 = vsel %vm1032_vm3, %v1062_v31, 0.0  ;;  %v1073_v36 = vperm.slane %v379_v50, %v1685_v34 }
 0x1af   : > { %v1024_v30 = vsel %vm992_vm1, %v1020_v21, 0.0  ;;  %v1025_v12 = vadd.f32 %v1023_v45, %v985_v22 }
 0x1b0   : > { %v1026_v46 = vadd.f32 %v1024_v30, %v986_v44  ;;  %v1075_v3 = vmul.f32 %v1073_v36, %v1690_v38 }
 0x1b1   : > { %v1067_v27 = vadd.f32 %v1065_v19, %v1025_v12 }
 0x1b2   : > { %v1068_v51 = vadd.f32 %v1066_v41, %v1026_v46 }
 0x1b3   : > { %v1076_v48 = vperm.slane %v1067_v27, 2 }
 0x1b4   : > { %v1077_v54 = vperm.slane %v1068_v51, 2 }
 0x1b5   : > { %v1078_v42 = vmul.f32 %v1713_v39, %v1076_v48 }
 0x1b6   : > { %v1079_v0 = vmul.f32 %v1713_v39, %v1077_v54 }
 0x1b8   : > { %v1082_v55 = vrot.slane %v1079_v0, 4 }
 0x1ba   : > { %v1084_v56 = vsel %vm1083_vm4, %v1078_v42, %v1082_v55 }
 0x1bb   : > { %v1086_v34 = vadd.f32 %v1084_v56, %v1075_v3 }
 0x1bd   : > { %1087 = vst [vmem:[%s1632_s17] sm:$0x77] %v1086_v34 }
 0x1be   : > { %1417 = shalt.err (!%p1414_p11)
}
 0x1bf   : > { %1249 = dma.vmem_to_hbm [thread:$0]  (%p1597_p7), %s1103_s13, 128, %s1105_s16, %s1089_s23  }
 0x1c0 PF: > { %p1255_p12 = scmp.ge.s32.totalorder %s1486_s15, 2  ;;  %s1116_s20 = sand.u32 1, %s1458_s9  }
 0x1c1   : > { %s1117_s17 = scalar_lea.sflag [#allocation6], %s1116_s20 }
 0x1c2   : > { %p1252_p13 = pnand %p1255_p12, %p1603_p9 }
 0x1c4   : > { %p1253_p0 = pneg %p1252_p13 }
 0x1c6   : > { %1453 = dma.done.wait (%p1253_p0), %s1117_s17, 128  }
 0x1c7   : > { %1455 = vsyncadd (%p1253_p0), %s1117_s17, 4294967168  ;;  %s29_s15 = sadd.s32 1, %s1486_s15   ;;  %s1996_s9 = smov %s1462_s10 }
 0x1c8   : > { %p26_p1 = scmp.ge.s32.totalorder %s29_s15, 8   ;;  %s1997_s10 = smov %s1466_s11 }
 0x1c9   : > { %s1998_s11 = smov %s1611_s25  ;;  %s1999_s12 = smov %s1478_s14 }
 0x1ca   : > { %s2000_s13 = smov %s1482_s0  ;;  %s2001_s14 = smov %s2004_s18 }
 0x1cb   : > { %s2002_s0 = smov %s2008_s19  ;;  %28 = sbr.rel (!%p26_p1) target bundleno = 11 (0xb), region = 123 }
 0x1d0   :  { %1123 = vsyncpa [#allocation6], 1 }
 0x1d1   :  { %1125 = vsyncpa [#allocation6 + $0x1], 1 }

</bundles_post_ra>
